<compile_context>
chip_gen: v6e
topology: v6e:2x2x1
jax: 0.10.0
libtpu: 0.0.40
codegen_flags: <defaults>
</compile_context>

<pallas_src>
import functools

import jax
import jax.numpy as jnp
from jax import lax
from jax.experimental import pallas as pl
from jax.experimental.pallas import tpu as pltpu


# x @ x^T via a shared contracting (last) dim -> no transposed operand copy.
_CONTRACT_LAST = (((1,), (1,)), ((), ()))


def _gram_kernel(x_ref, gram_ref, acc_ref):
    """Accumulate the raw (unnormalized) Gram matrix F @ F^T over K tiles."""
    k = pl.program_id(0)

    @pl.when(k == 0)
    def _():
        acc_ref[...] = jnp.zeros_like(acc_ref)

    acc_ref[...] += lax.dot_general(
        x_ref[...], x_ref[...],
        dimension_numbers=_CONTRACT_LAST,
        preferred_element_type=jnp.float32)

    @pl.when(k == pl.num_programs(0) - 1)
    def _():
        gram_ref[...] = acc_ref[...]


def _style_loss_kernel(gt_ref, x_ref, loss_ref, acc_ref, *, scale):
    """Accumulate raw Gram of x over K tiles; at the last step compare against
    the precomputed raw target Gram and emit the normalized MSE scalar."""
    k = pl.program_id(0)

    @pl.when(k == 0)
    def _():
        acc_ref[...] = jnp.zeros_like(acc_ref)

    acc_ref[...] += lax.dot_general(
        x_ref[...], x_ref[...],
        dimension_numbers=_CONTRACT_LAST,
        preferred_element_type=jnp.float32)

    @pl.when(k == pl.num_programs(0) - 1)
    def _():
        diff = acc_ref[...] - gt_ref[...]
        # All normalizers folded into one exact scalar multiply.
        loss_ref[0, 0] = jnp.sum(diff * diff) * jnp.float32(scale)


def _choose_tk(rows, cols, dtype, vmem_budget_bytes=8 * 1024 * 1024):
    """Largest multiple-of-128 divisor of cols such that the double-buffered
    (rows, TK) input stream stays within a conservative VMEM budget (fits the
    default scoped VMEM limit on v5e/v6e/v7x)."""
    itemsize = jnp.dtype(dtype).itemsize
    cap = max(128, vmem_budget_bytes // (2 * rows * itemsize))
    best = None
    tk = 128
    upper = min(cols, cap)
    while tk <= upper:
        if cols % tk == 0:
            best = tk
        tk += 128
    if best is None:
        # cols < 128 or not tileable by 128: fall back to the full axis
        # (block_shape equal to the full dim is always legal).
        return cols
    return best


def _gram_raw(x2d, tk):
    """Raw (unnormalized) Gram matrix of a (rows, cols) feature map."""
    rows, cols = x2d.shape
    grid_k = cols // tk
    itemsize = jnp.dtype(x2d.dtype).itemsize
    return pl.pallas_call(
        _gram_kernel,
        out_shape=jax.ShapeDtypeStruct((rows, rows), jnp.float32),
        grid_spec=pltpu.PrefetchScalarGridSpec(
            num_scalar_prefetch=0,
            grid=(grid_k,),
            in_specs=[pl.BlockSpec((rows, tk), lambda k: (0, k))],
            out_specs=pl.BlockSpec((rows, rows), lambda k: (0, 0)),
            scratch_shapes=[pltpu.VMEM((rows, rows), jnp.float32)]),
        compiler_params=pltpu.CompilerParams(
            dimension_semantics=("arbitrary",)),
        cost_estimate=pl.CostEstimate(
            flops=2 * rows * rows * cols,
            transcendentals=0,
            bytes_accessed=rows * cols * itemsize + rows * rows * 4),
    )(x2d)


def make_style_loss(target, feature_dtype=None):
    """Mirrors StyleLoss.__init__: precompute the (detached, constant) target
    Gram once. Returns forward(x) -> (x, loss)."""
    a, b, c, d = target.shape
    rows, cols = a * b, c * d

    if feature_dtype is not None:
        # e.g. bf16 streaming on v5e to halve HBM bytes; MXU still accumulates f32.
        target = target.astype(feature_dtype)
    stream_dtype = target.dtype

    tk = _choose_tk(rows, cols, stream_dtype)
    grid_k = cols // tk
    itemsize = jnp.dtype(stream_dtype).itemsize

    gt_raw = _gram_raw(target.reshape(rows, cols), tk)

    norm = float(rows * cols)                    # a*b*c*d Gram normalizer
    scale = 1.0 / (norm * norm * float(rows) * float(rows))

    kernel = functools.partial(_style_loss_kernel, scale=scale)

    loss_call = pl.pallas_call(
        kernel,
        out_shape=jax.ShapeDtypeStruct((1, 1), jnp.float32),
        grid_spec=pltpu.PrefetchScalarGridSpec(
            num_scalar_prefetch=0,
            grid=(grid_k,),
            in_specs=[
                pl.BlockSpec((rows, rows), lambda k: (0, 0)),  # resident Gt
                pl.BlockSpec((rows, tk), lambda k: (0, k)),    # streamed x
            ],
            out_specs=pl.BlockSpec((1, 1), lambda k: (0, 0)),
            scratch_shapes=[pltpu.VMEM((rows, rows), jnp.float32)]),
        compiler_params=pltpu.CompilerParams(
            dimension_semantics=("arbitrary",)),
        cost_estimate=pl.CostEstimate(
            flops=2 * rows * rows * cols,
            transcendentals=0,
            bytes_accessed=rows * cols * itemsize + rows * rows * 4 + 4),
    )

    def forward(x):
        assert x.shape == (a, b, c, d)
        xs = x.astype(stream_dtype) if feature_dtype is not None else x
        loss = loss_call(gt_raw, xs.reshape(rows, cols))
        # Module returns its input unchanged; loss is the stored side effect.
        return x, loss[0, 0]

    return forward


def _reference_loss(x, target):
    a, b, c, d = x.shape

    def gram(v):
        f = v.reshape(a * b, c * d).astype(jnp.float32)
        return (f @ f.T) / (a * b * c * d)

    gx, gt = gram(x), gram(target)
    return jnp.mean((gx - gt) ** 2)


if __name__ == "__main__":
    key = jax.random.PRNGKey(0)
    k1, k2 = jax.random.split(key)

    # Small NCHW feature maps: batch=2, channels=4, spatial=16x16.
    x = jax.random.normal(k1, (2, 4, 16, 16), dtype=jnp.float32)
    target = jax.random.normal(k2, (2, 4, 16, 16), dtype=jnp.float32)

    forward = make_style_loss(target)
    out, loss = forward(x)
    out = jax.block_until_ready(out)
    loss = jax.block_until_ready(loss)

    # Module returns its input unchanged.
    assert out.shape == x.shape
    assert bool(jnp.allclose(out, x))

    # Check the Pallas loss against a pure-JAX reference.
    ref = _reference_loss(x, target)
    assert bool(jnp.allclose(loss, ref, rtol=2e-5, atol=1e-6)), (float(loss), float(ref))

    print("KERNEL_OK")
</pallas_src>

<mosaic_0001>
module attributes {stable_mosaic.version = 11 : i64} {
  func.func @_gram_kernel(%arg0: i32, %arg1: memref<8x256xf32, #tpu.memory_space<vmem>>, %arg2: memref<8x8xf32, #tpu.memory_space<vmem>>, %arg3: memref<8x8xf32, #tpu.memory_space<vmem>>) attributes {dimension_semantics = [#tpu.dimension_semantics<arbitrary>], iteration_bounds = array<i64: 1>, scalar_prefetch = 0 : i64, scratch_operands = 1 : i64, tpu.core_type = #tpu.core_type<tc>, window_params = [{transform_indices = @transform_0, window_bounds = array<i64: 8, 256>}, {pipeline_mode = #tpu.pipeline_mode<synchronous>, transform_indices = @transform_1, window_bounds = array<i64: 8, 8>}]} {
    %c0_i32 = arith.constant 0 : i32
    %0 = arith.cmpi eq, %arg0, %c0_i32 : i32
    %1 = arith.extui %0 : i1 to i32
    %c0_i32_0 = arith.constant 0 : i32
    %2 = arith.cmpi ne, %1, %c0_i32_0 : i32
    scf.if %2 {
      %cst_10 = arith.constant 0.000000e+00 : f32
      %12 = vector.broadcast %cst_10 : f32 to vector<8x8xf32>
      %c0_11 = arith.constant 0 : index
      %c0_12 = arith.constant 0 : index
      %13 = vector.load %arg3[%c0_11, %c0_12] : memref<8x8xf32, #tpu.memory_space<vmem>>, vector<8x8xf32>
      tpu.vector_store %arg3[%c0_11, %c0_12], %12 {strides = array<i32>} : memref<8x8xf32, #tpu.memory_space<vmem>>, vector<8x8xf32>,
    } else {
    }
    %c0 = arith.constant 0 : index
    %c0_1 = arith.constant 0 : index
    %3 = vector.load %arg3[%c0, %c0_1] : memref<8x8xf32, #tpu.memory_space<vmem>>, vector<8x8xf32>
    %c0_2 = arith.constant 0 : index
    %c0_3 = arith.constant 0 : index
    %4 = vector.load %arg1[%c0_2, %c0_3] : memref<8x256xf32, #tpu.memory_space<vmem>>, vector<8x256xf32>
    %c0_4 = arith.constant 0 : index
    %c0_5 = arith.constant 0 : index
    %5 = vector.load %arg1[%c0_4, %c0_5] : memref<8x256xf32, #tpu.memory_space<vmem>>, vector<8x256xf32>
    %cst = arith.constant dense<0.000000e+00> : vector<8x8xf32>
    %6 = tpu.matmul %4, %5, %cst {dimension_numbers = #tpu.dot_dimension_numbers<[1], [1], [0], [0], [0, 0, 1, 0], [], []>} : vector<8x256xf32>, vector<8x256xf32>, vector<8x8xf32> -> vector<8x8xf32>
    %7 = arith.addf %3, %6 : vector<8x8xf32>
    %c0_6 = arith.constant 0 : index
    %c0_7 = arith.constant 0 : index
    %8 = vector.load %arg3[%c0_6, %c0_7] : memref<8x8xf32, #tpu.memory_space<vmem>>, vector<8x8xf32>
    tpu.vector_store %arg3[%c0_6, %c0_7], %7 {strides = array<i32>} : memref<8x8xf32, #tpu.memory_space<vmem>>, vector<8x8xf32>,
    %c0_i32_8 = arith.constant 0 : i32
    %9 = arith.cmpi eq, %arg0, %c0_i32_8 : i32
    %10 = arith.extui %9 : i1 to i32
    %c0_i32_9 = arith.constant 0 : i32
    %11 = arith.cmpi ne, %10, %c0_i32_9 : i32
    scf.if %11 {
      %c0_10 = arith.constant 0 : index
      %c0_11 = arith.constant 0 : index
      %12 = vector.load %arg3[%c0_10, %c0_11] : memref<8x8xf32, #tpu.memory_space<vmem>>, vector<8x8xf32>
      %c0_12 = arith.constant 0 : index
      %c0_13 = arith.constant 0 : index
      %13 = vector.load %arg2[%c0_12, %c0_13] : memref<8x8xf32, #tpu.memory_space<vmem>>, vector<8x8xf32>
      tpu.vector_store %arg2[%c0_12, %c0_13], %12 {strides = array<i32>} : memref<8x8xf32, #tpu.memory_space<vmem>>, vector<8x8xf32>,
    } else {
    }
    return
  }
  func.func @transform_0(%arg0: i32) -> (i32, i32) {
    %c0_i32 = arith.constant 0 : i32
    %c0_i32_0 = arith.constant 0 : i32
    return %c0_i32, %arg0 : i32, i32
  }
  func.func @transform_1(%arg0: i32) -> (i32, i32) {
    %c0_i32 = arith.constant 0 : i32
    %c0_i32_0 = arith.constant 0 : i32
    %c0_i32_1 = arith.constant 0 : i32
    return %c0_i32, %c0_i32_0 : i32, i32
  }
}

</mosaic_0001>

<bundles_post_ra>
// kernel: tpu_custom_call.1
= control target key start
LH: loop header
LB: loop body
LE: loop exit
PB: predicated region body
PF: predicated region fallthrough
CT: control target
= control target key end

     0   :  { %6 = vsyncpa [#allocation4], 0  ;;  %s192_s0 = inlined_call_operand.hbm [shape: f32[8,256], index: 0, kind: input, shape index: {}]   ;;  %s193_s1 = inlined_call_operand.hbm [shape: f32[8,8], index: 1, kind: output, shape index: {}]  }
   0x1   :  { %7 = vsyncpa [#allocation5], 0  ;;  %s170_s6 = smov [#allocation3]  }
   0x2   :  { %s14_s7 = sshll.u32 %s170_s6, 4  ;;  %s15_s7 = int_to_ptr.vmem [resolvable:$true] %s14_s7 }
   0x3   :  { %s134_s8 = scalar_lea.vmem %s15_s7, 256  ;;  %p139_p1 = scmp.lt.s32.totalorder %s15_s7, %s15_s7 }
   0x4   :  { %p135_p0 = scmp.ne.s32.totalorder %s15_s7, %s134_s8  ;;  %p140_p2 = scmp.lt.s32.totalorder %s134_s8, %s134_s8 }
   0x6   :  { %p141_p3 = por %p140_p2, %p139_p1 }
   0x8   :  { %p142_p4 = pnand %p141_p3, %p135_p0 }
   0xa   :  { %145 = shalt.err (!%p142_p4)
}
   0xb   :  { %17 = dma.hbm_to_vmem [thread:$0]  %s192_s0, 256, %s15_s7, [#allocation4]  }
   0xc   :  { %166 = dma.done.wait [#allocation4], 256  }
   0xd   :  { %167 = vsyncadd [#allocation4], 4294967040  ;;  %vm25_vm0 = vcmask 64512   ;;  %v171_v0 = vmov 0.0   ;;  %v29_v1 = vld [vmem:[#allocation3 + $0x8] sm:$0xff]  ;;  %v28_v2 = vld [vmem:[#allocation3] sm:$0xff] }
   0xe   :  { %26 = vst.msk [vmem:[#allocation2] sm:$0xff] %vm25_vm0, %v171_v0  ;;  %60 = vmatprep.subr.mxu0 %v29_v1  ;;  %94 = vmatprep.mubr.f32.mxu0 %v29_v1  ;;  %s172_s11 = smov [#allocation6]  }
   0xf   :  { %61 = vmatpush1.xpose.msra.mxu0 %v28_v2  ;;  %s114_s0 = sshll.u32 %s172_s11, 4  ;;  %s115_s0 = int_to_ptr.vmem [resolvable:$true] %s114_s0 }
  0x10   :  { %s146_s12 = scalar_lea.vmem %s115_s0, 128  ;;  %p151_p6 = scmp.lt.s32.totalorder %s115_s0, %s115_s0 }
  0x11   :  { %p147_p5 = scmp.ne.s32.totalorder %s115_s0, %s146_s12  ;;  %p152_p7 = scmp.lt.s32.totalorder %s146_s12, %s146_s12 }
  0x12   :  { %95 = vmatmul.mubr.f32.vlgmr.msra.gmra.mxu0 %v28_v2 }
  0x13   :  { %p153_p8 = por %p152_p7, %p151_p6 }
  0x15   :  { %v27_v3 = vld [vmem:[#allocation2] sm:$0xff]  ;;  %p154_p9 = pnand %p153_p8, %p147_p5 }
  0xd2   :  { %v96_v4 = vpop.f32.mrf.mxu0 }
  0xd3   :  { %v100_v5 = vadd.f32 %v96_v4, %v27_v3 }
  0xd4   :  { %v98_v6 = vpop.f32.mrf.mxu0 }
  0xd5   :  { %102 = vst.msk [vmem:[#allocation2] sm:$0xff] %vm25_vm0, %v100_v5 }
  0xdc   :  { %v106_v7 = vld [vmem:[#allocation2] sm:$0xff] }
  0xdd   :  { %107 = vst.msk [vmem:[#allocation6] sm:$0xff] %vm25_vm0, %v106_v7 }
  0xde   :  { %157 = shalt.err (!%p154_p9)
}
  0xdf   :  { %117 = dma.vmem_to_hbm [thread:$0]  %s115_s0, 128, %s193_s1, [#allocation5]  }
  0xe0   :  { %168 = dma.done.wait [#allocation5], 128  }
  0xe1   :  { %169 = vsyncadd [#allocation5], 4294967168 }
  0xe2   :  { %121 = vsyncpa [#allocation4], 1 }
  0xe3   :  { %122 = vsyncpa [#allocation5], 1 }

</bundles_post_ra>
